<compile_context>
chip_gen: v6e
topology: v6e:2x2x1
jax: 0.10.0
libtpu: 0.0.40
codegen_flags: <defaults>
</compile_context>

<pallas_src>
import functools

import jax
import jax.numpy as jnp
from jax import lax
from jax.experimental import pallas as pl
from jax.experimental.pallas import tpu as pltpu


def _round_up(x, m):
    return (x + m - 1) // m * m


def _affine_kernel(x_ref, w_ref, b_ref, o_ref, acc_ref):
    # x_ref:   (tm, tk)  input tile
    # w_ref:   (tn, tk)  weight tile, original (out_dim, in_dim) layout
    # b_ref:   (1,  tn)  bias row tile
    # o_ref:   (tm, tn)  output tile (lane-dense, tn % 128 == 0)
    # acc_ref: (tm, tn)  f32 accumulator scratch, resident across the K axis
    k = pl.program_id(2)

    @pl.when(k == 0)
    def _():
        acc_ref[...] = jnp.zeros_like(acc_ref)

    # Contract last dims of x and W  ->  x @ W^T, f32 accumulation on the MXU.
    acc_ref[...] += lax.dot_general(
        x_ref[...], w_ref[...],
        dimension_numbers=(((1,), (1,)), ((), ())),
        preferred_element_type=jnp.float32,
    )

    @pl.when(k == pl.num_programs(2) - 1)
    def _():
        o_ref[...] = (acc_ref[...] + b_ref[...].astype(jnp.float32)).astype(o_ref.dtype)


@functools.partial(jax.jit, static_argnames=("block_m", "block_n", "block_k"))
def affine_linear(x, weight, bias, *, block_m=512, block_n=256, block_k=512):
    """nn.Linear forward: y = x @ weight.T + bias, weight shape (out_dim, in_dim)."""
    in_dim = x.shape[-1]
    out_dim = weight.shape[0]
    lead_shape = x.shape[:-1]

    x2d = x.reshape(-1, in_dim)
    m = x2d.shape[0]

    # Sublane alignment for the second-to-last dim: 8 for f32, 16 for bf16, ...
    sub = 8 * max(1, 4 // x.dtype.itemsize)

    # Tile sizes: M tile sublane-aligned, K/N tiles multiples of 128 lanes.
    # Default 512x256x512 tiles keep per-step VMEM (~4.5 MiB f32 incl. double
    # buffers + accumulator) well inside the scoped budget on v5e/v6e/v7x.
    tm = min(block_m, _round_up(m, sub))
    tn = min(block_n, _round_up(out_dim, 128))
    tk = min(block_k, _round_up(in_dim, 128))

    m_pad = _round_up(m, tm)
    n_pad = _round_up(out_dim, tn)
    k_pad = _round_up(in_dim, tk)

    # Zero-pad to tile boundaries (no-op when already aligned).  Padded K
    # columns contribute zero to the dot product; padded M rows / N columns
    # are sliced off after the call.
    x2d = jnp.pad(x2d, ((0, m_pad - m), (0, k_pad - in_dim)))
    w_p = jnp.pad(weight, ((0, n_pad - out_dim), (0, k_pad - in_dim)))
    b_p = jnp.pad(bias.reshape(1, out_dim), ((0, 0), (0, n_pad - out_dim)))

    grid = (m_pad // tm, n_pad // tn, k_pad // tk)

    cost = pl.CostEstimate(
        flops=2 * m * in_dim * out_dim,
        transcendentals=0,
        bytes_accessed=(x2d.size * x2d.dtype.itemsize
                        + w_p.size * w_p.dtype.itemsize
                        + b_p.size * b_p.dtype.itemsize
                        + m_pad * n_pad * x.dtype.itemsize),
    )

    out = pl.pallas_call(
        _affine_kernel,
        out_shape=jax.ShapeDtypeStruct((m_pad, n_pad), x.dtype),
        grid_spec=pltpu.PrefetchScalarGridSpec(
            num_scalar_prefetch=0,
            grid=grid,
            in_specs=[
                pl.BlockSpec((tm, tk), lambda i, j, k: (i, k)),   # x tile
                pl.BlockSpec((tn, tk), lambda i, j, k: (j, k)),   # W tile (out, in)
                pl.BlockSpec((1, tn), lambda i, j, k: (0, j)),    # bias tile
            ],
            out_specs=pl.BlockSpec((tm, tn), lambda i, j, k: (i, j)),
            scratch_shapes=[pltpu.VMEM((tm, tn), jnp.float32)],
        ),
        compiler_params=pltpu.CompilerParams(
            # M and N parallel (megacore-shardable), K (reduction) arbitrary & last.
            dimension_semantics=("parallel", "parallel", "arbitrary"),
        ),
        cost_estimate=cost,
    )(x2d, w_p, b_p)

    # TODO(synk): optional bf16 (v6e) / fp8 (v7x) weight path with f32 accumulation
    # would halve HBM traffic; kept f32 here to match nn.Linear numerics exactly.
    out = out[:m, :out_dim]
    return out.reshape(*lead_shape, out_dim)


if __name__ == "__main__":
    # Small shapes consistent with the module: AffineLinear(in_dim=32, out_dim=32)
    # applied to a (batch=2, seq=8, in_dim=32) tensor.
    batch, seq, in_dim, out_dim = 2, 8, 32, 32

    key = jax.random.PRNGKey(0)
    kx, kw, kb = jax.random.split(key, 3)

    x = jax.random.normal(kx, (batch, seq, in_dim), dtype=jnp.float32)
    # Deterministic parameter init mimicking nn.Linear's uniform(-1/sqrt(in), 1/sqrt(in)).
    bound = 1.0 / jnp.sqrt(jnp.float32(in_dim))
    weight = jax.random.uniform(kw, (out_dim, in_dim), jnp.float32, -bound, bound)
    bias = jax.random.uniform(kb, (out_dim,), jnp.float32, -bound, bound)

    y = affine_linear(x, weight, bias)
    y = jax.block_until_ready(y)

    # Reference check against plain JAX (same math as torch.nn.Linear).
    y_ref = x @ weight.T + bias
    assert y.shape == (batch, seq, out_dim)
    assert jnp.allclose(y, y_ref, atol=1e-5, rtol=1e-5)

    print("KERNEL_OK")
</pallas_src>

<mosaic_0001>
module attributes {stable_mosaic.version = 11 : i64} {
  func.func @_affine_kernel(%arg0: i32, %arg1: i32, %arg2: i32, %arg3: memref<16x128xf32, #tpu.memory_space<vmem>>, %arg4: memref<128x128xf32, #tpu.memory_space<vmem>>, %arg5: memref<1x128xf32, #tpu.memory_space<vmem>>, %arg6: memref<16x128xf32, #tpu.memory_space<vmem>>, %arg7: memref<16x128xf32, #tpu.memory_space<vmem>>) attributes {dimension_semantics = [#tpu.dimension_semantics<parallel>, #tpu.dimension_semantics<parallel>, #tpu.dimension_semantics<arbitrary>], iteration_bounds = array<i64: 1, 1, 1>, scalar_prefetch = 0 : i64, scratch_operands = 1 : i64, tpu.core_type = #tpu.core_type<tc>, window_params = [{transform_indices = @transform_0, window_bounds = array<i64: 16, 128>}, {transform_indices = @transform_1, window_bounds = array<i64: 128, 128>}, {transform_indices = @transform_2, window_bounds = array<i64: 1, 128>}, {transform_indices = @transform_3, window_bounds = array<i64: 16, 128>}]} {
    %c0_i32 = arith.constant 0 : i32
    %0 = arith.cmpi eq, %arg2, %c0_i32 : i32
    %1 = arith.extui %0 : i1 to i32
    %c0_i32_0 = arith.constant 0 : i32
    %2 = arith.cmpi ne, %1, %c0_i32_0 : i32
    scf.if %2 {
      %cst_10 = arith.constant 0.000000e+00 : f32
      %12 = vector.broadcast %cst_10 : f32 to vector<16x128xf32>
      %c0_11 = arith.constant 0 : index
      %c0_12 = arith.constant 0 : index
      %13 = vector.load %arg7[%c0_11, %c0_12] : memref<16x128xf32, #tpu.memory_space<vmem>>, vector<16x128xf32>
      tpu.vector_store %arg7[%c0_11, %c0_12], %12 {strides = array<i32>} : memref<16x128xf32, #tpu.memory_space<vmem>>, vector<16x128xf32>,
    } else {
    }
    %c0 = arith.constant 0 : index
    %c0_1 = arith.constant 0 : index
    %3 = vector.load %arg7[%c0, %c0_1] : memref<16x128xf32, #tpu.memory_space<vmem>>, vector<16x128xf32>
    %c0_2 = arith.constant 0 : index
    %c0_3 = arith.constant 0 : index
    %4 = vector.load %arg3[%c0_2, %c0_3] : memref<16x128xf32, #tpu.memory_space<vmem>>, vector<16x128xf32>
    %c0_4 = arith.constant 0 : index
    %c0_5 = arith.constant 0 : index
    %5 = vector.load %arg4[%c0_4, %c0_5] : memref<128x128xf32, #tpu.memory_space<vmem>>, vector<128x128xf32>
    %cst = arith.constant dense<0.000000e+00> : vector<16x128xf32>
    %6 = tpu.matmul %4, %5, %cst {dimension_numbers = #tpu.dot_dimension_numbers<[1], [1], [0], [0], [0, 0, 1, 0], [], []>} : vector<16x128xf32>, vector<128x128xf32>, vector<16x128xf32> -> vector<16x128xf32>
    %7 = arith.addf %3, %6 : vector<16x128xf32>
    %c0_6 = arith.constant 0 : index
    %c0_7 = arith.constant 0 : index
    %8 = vector.load %arg7[%c0_6, %c0_7] : memref<16x128xf32, #tpu.memory_space<vmem>>, vector<16x128xf32>
    tpu.vector_store %arg7[%c0_6, %c0_7], %7 {strides = array<i32>} : memref<16x128xf32, #tpu.memory_space<vmem>>, vector<16x128xf32>,
    %c0_i32_8 = arith.constant 0 : i32
    %9 = arith.cmpi eq, %arg2, %c0_i32_8 : i32
    %10 = arith.extui %9 : i1 to i32
    %c0_i32_9 = arith.constant 0 : i32
    %11 = arith.cmpi ne, %10, %c0_i32_9 : i32
    scf.if %11 {
      %c0_10 = arith.constant 0 : index
      %c0_11 = arith.constant 0 : index
      %12 = vector.load %arg7[%c0_10, %c0_11] : memref<16x128xf32, #tpu.memory_space<vmem>>, vector<16x128xf32>
      %c0_12 = arith.constant 0 : index
      %c0_13 = arith.constant 0 : index
      %13 = vector.load %arg5[%c0_12, %c0_13] : memref<1x128xf32, #tpu.memory_space<vmem>>, vector<1x128xf32>
      %14 = vector.broadcast %13 : vector<1x128xf32> to vector<16x128xf32>
      %15 = arith.addf %12, %14 : vector<16x128xf32>
      %c0_14 = arith.constant 0 : index
      %c0_15 = arith.constant 0 : index
      %16 = vector.load %arg6[%c0_14, %c0_15] : memref<16x128xf32, #tpu.memory_space<vmem>>, vector<16x128xf32>
      tpu.vector_store %arg6[%c0_14, %c0_15], %15 {strides = array<i32>} : memref<16x128xf32, #tpu.memory_space<vmem>>, vector<16x128xf32>,
    } else {
    }
    return
  }
  func.func @transform_0(%arg0: i32, %arg1: i32, %arg2: i32) -> (i32, i32) {
    %c0_i32 = arith.constant 0 : i32
    return %arg0, %arg2 : i32, i32
  }
  func.func @transform_1(%arg0: i32, %arg1: i32, %arg2: i32) -> (i32, i32) {
    %c0_i32 = arith.constant 0 : i32
    return %arg1, %arg2 : i32, i32
  }
  func.func @transform_2(%arg0: i32, %arg1: i32, %arg2: i32) -> (i32, i32) {
    %c0_i32 = arith.constant 0 : i32
    %c0_i32_0 = arith.constant 0 : i32
    return %c0_i32, %arg1 : i32, i32
  }
  func.func @transform_3(%arg0: i32, %arg1: i32, %arg2: i32) -> (i32, i32) {
    %c0_i32 = arith.constant 0 : i32
    return %arg0, %arg1 : i32, i32
  }
}

</mosaic_0001>

<bundles_post_ra>
// kernel: affine_linear.1
= control target key start
LH: loop header
LB: loop body
LE: loop exit
PB: predicated region body
PF: predicated region fallthrough
CT: control target
= control target key end

     0   :  { %s276_s1 = inlined_call_operand.vmem [shape: f32[128,128], index: 1, kind: input, shape index: {}]   ;;  %s277_s0 = inlined_call_operand.vmem [shape: f32[16,128], index: 0, kind: input, shape index: {}]   ;;  %s278_s2 = inlined_call_operand.vmem [shape: f32[1,128], index: 2, kind: input, shape index: {}]   ;;  %s279_s3 = inlined_call_operand.vmem [shape: f32[16,128], index: 3, kind: output, shape index: {}]  }
   0x1   :  { %v39_v0 = vld [vmem:[%s276_s1 + $0x78] sm:$0xff]  ;;  %v38_v1 = vld [vmem:[%s276_s1 + $0x70] sm:$0xff]  ;;  %v37_v2 = vld [vmem:[%s276_s1 + $0x68] sm:$0xff] }
   0x2   :  { %158 = vmatprep.subr.mxu0 %v39_v0  ;;  %v22_v3 = vld [vmem:[%s277_s0] sm:$0xff]  ;;  %v35_v5 = vld [vmem:[%s276_s1 + $0x58] sm:$0xff]  ;;  %v34_v6 = vld [vmem:[%s276_s1 + $0x50] sm:$0xff] }
   0x3   :  { %159 = vmatpush3.xpose.msra.mxu0 %v39_v0  ;;  %190 = vmatprep.mubr.f32.mxu0 %v22_v3  ;;  %v36_v4 = vld [vmem:[%s276_s1 + $0x60] sm:$0xff]  ;;  %v33_v7 = vld [vmem:[%s276_s1 + $0x48] sm:$0xff]  ;;  %v31_v9 = vld [vmem:[%s276_s1 + $0x38] sm:$0xff] }
   0x4   :  { %160 = vmatprep.subr.mxu0 %v38_v1  ;;  %v32_v8 = vld [vmem:[%s276_s1 + $0x40] sm:$0xff]  ;;  %v30_v10 = vld [vmem:[%s276_s1 + $0x30] sm:$0xff]  ;;  %v29_v11 = vld [vmem:[%s276_s1 + $0x28] sm:$0xff] }
   0x5   :  { %v28_v12 = vld [vmem:[%s276_s1 + $0x20] sm:$0xff]  ;;  %v27_v13 = vld [vmem:[%s276_s1 + $0x18] sm:$0xff]  ;;  %v26_v14 = vld [vmem:[%s276_s1 + $0x10] sm:$0xff] }
   0x6   :  { %v25_v15 = vld [vmem:[%s276_s1 + $0x8] sm:$0xff]  ;;  %v24_v16 = vld [vmem:[%s276_s1] sm:$0xff] }
   0x7   :  { %161 = vmatpush3.xpose.msra.mxu0 %v38_v1  ;;  %v23_v17 = vld [vmem:[%s277_s0 + $0x8] sm:$0xff]  ;;  %v139_v18 = vld [vmem:[%s278_s2] ss:$0 sm:$0xff] }
   0x8   :  { %162 = vmatprep.subr.mxu0 %v37_v2 }
   0xb   :  { %163 = vmatpush3.xpose.msra.mxu0 %v37_v2 }
   0xc   :  { %164 = vmatprep.subr.mxu0 %v36_v4 }
   0xf   :  { %165 = vmatpush3.xpose.msra.mxu0 %v36_v4 }
  0x10   :  { %166 = vmatprep.subr.mxu0 %v35_v5 }
  0x13   :  { %167 = vmatpush3.xpose.msra.mxu0 %v35_v5 }
  0x14   :  { %168 = vmatprep.subr.mxu0 %v34_v6 }
  0x17   :  { %169 = vmatpush3.xpose.msra.mxu0 %v34_v6 }
  0x18   :  { %170 = vmatprep.subr.mxu0 %v33_v7 }
  0x1b   :  { %171 = vmatpush3.xpose.msra.mxu0 %v33_v7 }
  0x1c   :  { %172 = vmatprep.subr.mxu0 %v32_v8 }
  0x1f   :  { %173 = vmatpush3.xpose.msra.mxu0 %v32_v8 }
  0x20   :  { %174 = vmatprep.subr.mxu0 %v31_v9 }
  0x23   :  { %175 = vmatpush3.xpose.msra.mxu0 %v31_v9 }
  0x24   :  { %176 = vmatprep.subr.mxu0 %v30_v10 }
  0x27   :  { %177 = vmatpush3.xpose.msra.mxu0 %v30_v10 }
  0x28   :  { %178 = vmatprep.subr.mxu0 %v29_v11 }
  0x2b   :  { %179 = vmatpush3.xpose.msra.mxu0 %v29_v11 }
  0x2c   :  { %180 = vmatprep.subr.mxu0 %v28_v12 }
  0x2f   :  { %181 = vmatpush3.xpose.msra.mxu0 %v28_v12 }
  0x30   :  { %182 = vmatprep.subr.mxu0 %v27_v13 }
  0x33   :  { %183 = vmatpush3.xpose.msra.mxu0 %v27_v13 }
  0x34   :  { %184 = vmatprep.subr.mxu0 %v26_v14 }
  0x37   :  { %185 = vmatpush3.xpose.msra.mxu0 %v26_v14 }
  0x38   :  { %186 = vmatprep.subr.mxu0 %v25_v15 }
  0x3b   :  { %187 = vmatpush3.xpose.msra.mxu0 %v25_v15 }
  0x3c   :  { %188 = vmatprep.subr.mxu0 %v24_v16 }
  0x3f   :  { %189 = vmatpush3.xpose.msra.mxu0 %v24_v16 }
  0x42   :  { %191 = vmatmul.mubr.f32.vlgmr.msra.gmra.mxu0 %v23_v17 }
 0x102   :  { %v192_v19 = vpop.f32.mrf.mxu0 }
 0x103   :  { %v132_v20 = vadd.f32 %v192_v19, %v139_v18 }
 0x104   :  { %v106_v21 = vpop.f32.mrf.mxu0 }
 0x105   :  { %134 = vst [vmem:[%s279_s3 + $0x8] sm:$0xff] %v132_v20  ;;  %v131_v22 = vadd.f32 %v139_v18, %v106_v21 }
 0x107   :  { %133 = vst [vmem:[%s279_s3] sm:$0xff] %v131_v22 }

</bundles_post_ra>
